<compile_context>
chip_gen: v7x
topology: tpu7x:2x2x1
jax: 0.10.0
libtpu: 0.0.40
codegen_flags: <defaults>
</compile_context>

<pallas_src>
import functools

import jax
import jax.numpy as jnp
from jax.experimental import pallas as pl
from jax.experimental.pallas import tpu as pltpu

EPS = 1e-5     # PyTorch BatchNorm2d default
SLOPE = 0.2    # LeakyReLU negative slope


# ----------------------------- Pallas kernels ------------------------------

def _conv_stats_kernel(w_ref, p_ref, y_ref, sum_ref, sq_ref):
    """(Cout, K) @ (K, TM) matmul (lane-dense output) + per-channel sum /
    sum-of-squares accumulated directly into resident output blocks."""
    i = pl.program_id(0)
    y = jnp.dot(w_ref[...], p_ref[...], preferred_element_type=jnp.float32)
    y_ref[...] = y

    @pl.when(i == 0)
    def _():
        sum_ref[...] = jnp.zeros_like(sum_ref)
        sq_ref[...] = jnp.zeros_like(sq_ref)

    sum_ref[...] += jnp.sum(y, axis=1, keepdims=True)
    sq_ref[...] += jnp.sum(y * y, axis=1, keepdims=True)


def _bn_lrelu_kernel(y_ref, sum_ref, sq_ref, gamma_ref, beta_ref, o_ref, *,
                     count):
    """Training-mode BatchNorm (batch stats, biased variance) + LeakyReLU(0.2).
    Runs in place on the conv buffer (input_output_aliases)."""
    inv_n = 1.0 / count
    mean = sum_ref[...] * inv_n                       # (Cout, 1)
    # TODO(synk): E[y^2]-E[y]^2 can lose precision for large activation means;
    # fine for zero-mean conv outputs, switch to two-pass if tolerances tighten.
    var = sq_ref[...] * inv_n - mean * mean
    scale = jax.lax.rsqrt(var + EPS) * gamma_ref[...]
    shift = beta_ref[...] - mean * scale
    z = y_ref[...] * scale + shift                    # f32 elementwise
    o_ref[...] = jnp.where(z > 0, z, SLOPE * z)


def _conv_lrelu_kernel(w_ref, p_ref, o_ref):
    """Fused matmul + LeakyReLU for the `first=True` block (no BN)."""
    y = jnp.dot(w_ref[...], p_ref[...], preferred_element_type=jnp.float32)
    o_ref[...] = jnp.where(y > 0, y, SLOPE * y)


# ------------------------------ host wrapper --------------------------------

def _round_up(a, b):
    return ((a + b - 1) // b) * b


@functools.partial(jax.jit, static_argnames=("first",))
def discriminator_block(x, weight, gamma=None, beta=None, *, first=False):
    """Forward pass of DiscriminatorBlock.  x: (N, Cin, H, W) float32 NCHW.
    weight: (Cout, Cin, 4, 4) as in PyTorch Conv2d (bias=False)."""
    n, cin, h, w = x.shape
    cout, _, kk, _ = weight.shape
    ho = (h + 2 - kk) // 2 + 1
    wo = (w + 2 - kk) // 2 + 1
    m = n * ho * wo
    kdim = cin * kk * kk

    # --- glue: pad + strided im2col in K-major / M-on-lanes layout (bf16) ---
    xb = x.astype(jnp.bfloat16)
    xp = jnp.pad(xb, ((0, 0), (0, 0), (1, 1), (1, 1)))
    patches = [xp[:, :, kh:kh + 2 * ho - 1:2, kw:kw + 2 * wo - 1:2]
               for kh in range(kk) for kw in range(kk)]     # each (N,Cin,Ho,Wo)
    p = jnp.stack(patches, axis=2)                          # (N, Cin, KK, Ho, Wo)
    p = p.transpose(1, 2, 0, 3, 4)                          # (Cin, KK, N, Ho, Wo)
    pmat_t = p.reshape(kdim, m)                             # K on sublanes, M on lanes
    wmat_t = weight.astype(jnp.bfloat16).reshape(cout, kdim)

    # --- lane-dense tiling over M.  Padded columns are all-zero and the conv
    #     has no bias, so they contribute exactly zero to the BN statistics. ---
    tm = min(512, _round_up(m, 128))
    m_pad = _round_up(m, tm)
    if m_pad != m:
        pmat_t = jnp.pad(pmat_t, ((0, 0), (0, m_pad - m)))
    grid = (m_pad // tm,)

    w_spec = pl.BlockSpec((cout, kdim), lambda i: (0, 0))
    p_spec = pl.BlockSpec((kdim, tm), lambda i: (0, i))
    y_spec = pl.BlockSpec((cout, tm), lambda i: (0, i))
    s_spec = pl.BlockSpec((cout, 1), lambda i: (0, 0))

    cost = pl.CostEstimate(
        flops=2 * m_pad * kdim * cout,
        transcendentals=0,
        bytes_accessed=2 * m_pad * kdim + 2 * kdim * cout + 4 * m_pad * cout)

    if first:
        out_flat = pl.pallas_call(
            _conv_lrelu_kernel,
            grid=grid,
            in_specs=[w_spec, p_spec],
            out_specs=y_spec,
            out_shape=jax.ShapeDtypeStruct((cout, m_pad), jnp.float32),
            compiler_params=pltpu.CompilerParams(
                dimension_semantics=("parallel",)),
            cost_estimate=cost,
        )(wmat_t, pmat_t)
    else:
        conv, ssum, ssq = pl.pallas_call(
            _conv_stats_kernel,
            grid=grid,
            in_specs=[w_spec, p_spec],
            out_specs=[y_spec, s_spec, s_spec],
            out_shape=(
                jax.ShapeDtypeStruct((cout, m_pad), jnp.float32),
                jax.ShapeDtypeStruct((cout, 1), jnp.float32),
                jax.ShapeDtypeStruct((cout, 1), jnp.float32),
            ),
            compiler_params=pltpu.CompilerParams(
                dimension_semantics=("arbitrary",)),
            cost_estimate=cost,
        )(wmat_t, pmat_t)

        out_flat = pl.pallas_call(
            functools.partial(_bn_lrelu_kernel, count=float(m)),
            grid=grid,
            in_specs=[y_spec, s_spec, s_spec, s_spec, s_spec],
            out_specs=y_spec,
            out_shape=jax.ShapeDtypeStruct((cout, m_pad), jnp.float32),
            input_output_aliases={0: 0},
            compiler_params=pltpu.CompilerParams(
                dimension_semantics=("parallel",)),
        )(conv, ssum, ssq,
          gamma.astype(jnp.float32).reshape(cout, 1),
          beta.astype(jnp.float32).reshape(cout, 1))

    # Channel-major result -> NCHW (leading-axis permute only; lanes stay dense)
    out = out_flat[:, :m].reshape(cout, n, ho, wo)
    return out.transpose(1, 0, 2, 3)


# ------------------------------ pure-JAX reference ---------------------------

def _reference(x, weight, gamma, beta, first):
    y = jax.lax.conv_general_dilated(
        x, weight, window_strides=(2, 2), padding=[(1, 1), (1, 1)],
        dimension_numbers=("NCHW", "OIHW", "NCHW"),
        precision=jax.lax.Precision.HIGHEST)
    if not first:
        mean = jnp.mean(y, axis=(0, 2, 3), keepdims=True)
        var = jnp.mean((y - mean) ** 2, axis=(0, 2, 3), keepdims=True)
        y = ((y - mean) * jax.lax.rsqrt(var + EPS)
             * gamma.reshape(1, -1, 1, 1) + beta.reshape(1, -1, 1, 1))
    return jnp.where(y > 0, y, SLOPE * y)


# ----------------------------------- main ------------------------------------

if __name__ == "__main__":
    # TODO(synk): PyTorch BatchNorm also mutates running_mean/running_var
    # buffers during training; that stateful side effect is not modeled here.
    key = jax.random.PRNGKey(0)
    configs = [
        dict(name="first",  first=True,  cin=3, cout=8,  n=2, h=16, w=16),
        dict(name="middle", first=False, cin=4, cout=8,  n=2, h=16, w=16),
        dict(name="deep",   first=False, cin=8, cout=16, n=3, h=32, w=32),
    ]
    for cfg in configs:
        key, k1, k2, k3, k4 = jax.random.split(key, 5)
        x = jax.random.normal(k1, (cfg["n"], cfg["cin"], cfg["h"], cfg["w"]),
                              jnp.float32)
        weight = 0.1 * jax.random.normal(k2, (cfg["cout"], cfg["cin"], 4, 4),
                                         jnp.float32)
        gamma = 1.0 + 0.1 * jax.random.normal(k3, (cfg["cout"],), jnp.float32)
        beta = 0.1 * jax.random.normal(k4, (cfg["cout"],), jnp.float32)

        if cfg["first"]:
            out = discriminator_block(x, weight, first=True)
            ref = _reference(x, weight, None, None, True)
        else:
            out = discriminator_block(x, weight, gamma, beta, first=False)
            ref = _reference(x, weight, gamma, beta, False)
        out = jax.block_until_ready(out)

        assert out.shape == ref.shape, (cfg["name"], out.shape, ref.shape)
        # bf16 MXU inputs with f32 accumulation vs. f32 HIGHEST reference.
        if not jnp.allclose(out, ref, atol=5e-2, rtol=5e-2):
            raise SystemExit(
                f"mismatch in {cfg['name']}: "
                f"max abs err = {float(jnp.max(jnp.abs(out - ref)))}")

    print("KERNEL_OK")
</pallas_src>

<mosaic_0001>
module attributes {stable_mosaic.version = 11 : i64} {
  func.func @_conv_lrelu_kernel(%arg0: i32, %arg1: memref<8x48xbf16, #tpu.memory_space<vmem>>, %arg2: memref<48x128xbf16, #tpu.memory_space<vmem>>, %arg3: memref<8x128xf32, #tpu.memory_space<vmem>>) attributes {dimension_semantics = [#tpu.dimension_semantics<parallel>], iteration_bounds = array<i64: 1>, scalar_prefetch = 0 : i64, scratch_operands = 0 : i64, tpu.core_type = #tpu.core_type<tc>, window_params = [{pipeline_mode = #tpu.pipeline_mode<synchronous>, transform_indices = @transform_0, window_bounds = array<i64: 8, 48>}, {transform_indices = @transform_1, window_bounds = array<i64: 48, 128>}, {transform_indices = @transform_2, window_bounds = array<i64: 8, 128>}]} {
    %c0 = arith.constant 0 : index
    %c0_0 = arith.constant 0 : index
    %0 = vector.load %arg1[%c0, %c0_0] : memref<8x48xbf16, #tpu.memory_space<vmem>>, vector<8x48xbf16>
    %c0_1 = arith.constant 0 : index
    %c0_2 = arith.constant 0 : index
    %1 = vector.load %arg2[%c0_1, %c0_2] : memref<48x128xbf16, #tpu.memory_space<vmem>>, vector<48x128xbf16>
    %cst = arith.constant dense<0.000000e+00> : vector<8x128xf32>
    %2 = tpu.matmul %0, %1, %cst {dimension_numbers = #tpu.dot_dimension_numbers<[1], [0], [0], [1], [0, 0, 1, 1], [], []>} : vector<8x48xbf16>, vector<48x128xbf16>, vector<8x128xf32> -> vector<8x128xf32>
    %cst_3 = arith.constant 0.000000e+00 : f32
    %3 = vector.broadcast %cst_3 : f32 to vector<8x128xf32>
    %4 = arith.cmpf ogt, %2, %3 : vector<8x128xf32>
    %cst_4 = arith.constant 2.000000e-01 : f32
    %5 = vector.broadcast %cst_4 : f32 to vector<8x128xf32>
    %6 = arith.mulf %5, %2 : vector<8x128xf32>
    %7 = arith.select %4, %2, %6 : vector<8x128xi1>, vector<8x128xf32>
    %c0_5 = arith.constant 0 : index
    %c0_6 = arith.constant 0 : index
    %8 = vector.load %arg3[%c0_5, %c0_6] : memref<8x128xf32, #tpu.memory_space<vmem>>, vector<8x128xf32>
    tpu.vector_store %arg3[%c0_5, %c0_6], %7 {strides = array<i32>} : memref<8x128xf32, #tpu.memory_space<vmem>>, vector<8x128xf32>,
    return
  }
  func.func @transform_0(%arg0: i32) -> (i32, i32) {
    %c0_i32 = arith.constant 0 : i32
    %c0_i32_0 = arith.constant 0 : i32
    %c0_i32_1 = arith.constant 0 : i32
    return %c0_i32, %c0_i32_0 : i32, i32
  }
  func.func @transform_1(%arg0: i32) -> (i32, i32) {
    %c0_i32 = arith.constant 0 : i32
    %c0_i32_0 = arith.constant 0 : i32
    return %c0_i32, %arg0 : i32, i32
  }
  func.func @transform_2(%arg0: i32) -> (i32, i32) {
    %c0_i32 = arith.constant 0 : i32
    %c0_i32_0 = arith.constant 0 : i32
    return %c0_i32, %arg0 : i32, i32
  }
}

</mosaic_0001>

<bundles_post_ra>
// kernel: discriminator_block.1
= control target key start
LH: loop header
LB: loop body
LE: loop exit
PB: predicated region body
PF: predicated region fallthrough
CT: control target
= control target key end

     0   :  { %v112_v0 = vmov 0.0   ;;  %vm113_vm0 = vmmov 0   ;;  %vm37_vm1 = vcmask 392192   ;;  %s144_s1 = inlined_call_operand.vmem [shape: bf16[48,128], index: 1, kind: input, shape index: {}]   ;;  %s145_s0 = inlined_call_operand.vmem [shape: bf16[8,48], index: 0, kind: input, shape index: {}]   ;;  %s146_s2 = inlined_call_operand.vmem [shape: f32[8,128], index: 2, kind: output, shape index: {}]  }
   0x1   :  { %97 = vmatprep.subr.bf16.mxu0 %v112_v0  ;;  %v109_v1 = vld [vmem:[%s144_s1] sm:$0xff]   ;;  %103 = vmatprep.mubr.msk.bf16.mxu0 %vm113_vm0, %v112_v0  ;;  %v110_v2 = vld [vmem:[%s144_s1 + $0x8] sm:$0xff]   ;;  %v111_v3 = vld [vmem:[%s144_s1 + $0x10] sm:$0xff]  }
   0x2   :  { %98 = vmatpush3.bf16.msra.mxu0 %v109_v1  ;;  %v12_v4 = vld [vmem:[%s145_s0] sm:$0xf] }
   0x3   :  { %99 = vmatprep.subr.bf16.mxu0 %v112_v0 }
   0x6   :  { %100 = vmatpush3.bf16.msra.mxu0 %v110_v2 }
   0x7   :  { %101 = vmatprep.subr.bf16.mxu0 %v112_v0 }
   0xa   :  { %102 = vmatpush3.bf16.msra.mxu0 %v111_v3 }
   0xd   :  { %104 = vmatmul.mubr.msk.bf16.vlgmr.msra.gmra.mrb[0].mxu0 %vm37_vm1, %v12_v4 }
  0xe0   :  { %v75_v5 = vpop.f32.mrb[0].mxu0 }
  0xe1   :  { %vm81_vm2 = vcmp.gt.f32.partialorder %v75_v5, 0.0  ;;  %v82_v6 = vmul.f32 0.2, %v75_v5  ;;  %v105_v7 = vpop.f32.mrb[1].mxu0 }
  0xe2   :  { %v78_v8 = vpop.f32.mrb[2].mxu0 }
  0xe3   :  { %v83_v9 = vsel %vm81_vm2, %v75_v5, %v82_v6  ;;  %v106_v10 = vpop.f32.mrb[3].mxu0 }
  0xe4   :  { %84 = vst [vmem:[%s146_s2] sm:$0xff] %v83_v9 }

</bundles_post_ra>
